<compile_context>
chip_gen: v5e
topology: v5e:2x2
jax: 0.10.0
libtpu: 0.0.40
codegen_flags: <defaults>
</compile_context>

<pallas_src>
import jax
import jax.numpy as jnp
from jax.experimental import pallas as pl
from jax.experimental.pallas import tpu as pltpu

LANE = 128                # TPU lane width (fast axis of a vreg)
SUBLANE = 8               # f32 sublane granularity
DEFAULT_TILE_ROWS = 1024  # 1024 x 128 x 4B = 512 KiB per block


def _linear_kernel(wb_ref, x_ref, o_ref):
    # wb_ref: (2,) f32 in SMEM  -> [w, b]   (scalar reads, cheap)
    # x_ref : (tile_rows, 128) in VMEM
    # o_ref : (tile_rows, 128) in VMEM
    w = wb_ref[0]
    b = wb_ref[1]
    # Single VPU FMA over the whole lane-dense tile.
    o_ref[...] = (x_ref[...] * w + b).astype(o_ref.dtype)


def linear_1x1(x, weight, bias, *, tile_rows=DEFAULT_TILE_ROWS):
    """Equivalent of nn.Linear(1, 1, bias=True)(x) for x of shape (N, 1)."""
    n, f = x.shape
    assert f == 1, "in_features must be 1"
    dtype = x.dtype

    # Consolidate parameters into a single tiny SMEM buffer [w, b].
    wb = jnp.stack(
        [weight.reshape(()).astype(jnp.float32),
         bias.reshape(()).astype(jnp.float32)]
    )

    # --- lane-dense layout plumbing (pure reshape/pad, no extra math) ---
    rows_needed = -(-n // LANE)                       # cdiv(N, 128)
    if rows_needed <= tile_rows:
        # Shrink the tile for small inputs (keep sublane-aligned).
        tile_rows = max(SUBLANE, ((rows_needed + SUBLANE - 1) // SUBLANE) * SUBLANE)
    rows = ((rows_needed + tile_rows - 1) // tile_rows) * tile_rows
    n_pad = rows * LANE

    x_flat = x.reshape(n)
    if n_pad != n:
        x_flat = jnp.pad(x_flat, (0, n_pad - n))
    x2d = x_flat.reshape(rows, LANE)

    grid = (rows // tile_rows,)

    out2d = pl.pallas_call(
        _linear_kernel,
        out_shape=jax.ShapeDtypeStruct((rows, LANE), dtype),
        grid_spec=pl.GridSpec(
            grid=grid,
            in_specs=[
                # Whole (2,) parameter vector resident in SMEM for all steps.
                pl.BlockSpec(memory_space=pltpu.MemorySpace.SMEM),
                # Lane-dense input tile, auto double-buffered by Pallas.
                pl.BlockSpec((tile_rows, LANE), lambda i: (i, 0)),
            ],
            out_specs=pl.BlockSpec((tile_rows, LANE), lambda i: (i, 0)),
        ),
        compiler_params=pltpu.CompilerParams(
            # Independent blocks -> shard across both TensorCores on v7x.
            dimension_semantics=("parallel",),
        ),
    )(wb, x2d)

    # Undo the layout plumbing.
    return out2d.reshape(n_pad)[:n].reshape(n, 1)


if __name__ == "__main__":
    key = jax.random.PRNGKey(0)
    kx, kw, kb = jax.random.split(key, 3)

    # Deterministic "parameters" (PyTorch init for Linear(1,1) is U(-1, 1)).
    weight = jax.random.uniform(kw, (1, 1), jnp.float32, minval=-1.0, maxval=1.0)
    bias = jax.random.uniform(kb, (1,), jnp.float32, minval=-1.0, maxval=1.0)

    # Small input consistent with the module: batch of 8 scalars, shape (8, 1).
    x = jax.random.normal(kx, (8, 1), jnp.float32)

    y = linear_1x1(x, weight, bias)
    jax.block_until_ready(y)

    # Reference check against plain JAX (same math as torch.nn.Linear).
    y_ref = x @ weight.T + bias
    assert y.shape == y_ref.shape, "shape mismatch vs reference"
    assert jnp.allclose(y, y_ref, atol=1e-6), "mismatch vs reference"

    print("KERNEL_OK")
</pallas_src>

<mosaic_0001>
module attributes {stable_mosaic.version = 11 : i64} {
  func.func @_linear_kernel(%arg0: i32, %arg1: memref<2xf32, #tpu.memory_space<smem>>, %arg2: memref<8x128xf32, #tpu.memory_space<vmem>>, %arg3: memref<8x128xf32, #tpu.memory_space<vmem>>) attributes {dimension_semantics = [#tpu.dimension_semantics<parallel>], iteration_bounds = array<i64: 1>, scalar_prefetch = 0 : i64, scratch_operands = 0 : i64, tpu.core_type = #tpu.core_type<tc>, window_params = [{transform_indices = @transform_0, window_bounds = array<i64: 2>}, {transform_indices = @transform_1, window_bounds = array<i64: 8, 128>}, {transform_indices = @transform_2, window_bounds = array<i64: 8, 128>}]} {
    %c0 = arith.constant 0 : index
    %0 = memref.load %arg1[%c0] : memref<2xf32, #tpu.memory_space<smem>>
    %c1 = arith.constant 1 : index
    %1 = memref.load %arg1[%c1] : memref<2xf32, #tpu.memory_space<smem>>
    %c0_0 = arith.constant 0 : index
    %c0_1 = arith.constant 0 : index
    %2 = vector.load %arg2[%c0_0, %c0_1] : memref<8x128xf32, #tpu.memory_space<vmem>>, vector<8x128xf32>
    %3 = vector.broadcast %0 : f32 to vector<8x128xf32>
    %4 = arith.mulf %2, %3 : vector<8x128xf32>
    %5 = vector.broadcast %1 : f32 to vector<8x128xf32>
    %6 = arith.addf %4, %5 : vector<8x128xf32>
    %c0_2 = arith.constant 0 : index
    %c0_3 = arith.constant 0 : index
    %7 = vector.load %arg3[%c0_2, %c0_3] : memref<8x128xf32, #tpu.memory_space<vmem>>, vector<8x128xf32>
    tpu.vector_store %arg3[%c0_2, %c0_3], %6 {strides = array<i32>} : memref<8x128xf32, #tpu.memory_space<vmem>>, vector<8x128xf32>,
    return
  }
  func.func @transform_0(%arg0: i32) -> i32 {
    %c0_i32 = arith.constant 0 : i32
    %c0_i32_0 = arith.constant 0 : i32
    return %c0_i32 : i32
  }
  func.func @transform_1(%arg0: i32) -> (i32, i32) {
    %c0_i32 = arith.constant 0 : i32
    %c0_i32_0 = arith.constant 0 : i32
    return %arg0, %c0_i32 : i32, i32
  }
  func.func @transform_2(%arg0: i32) -> (i32, i32) {
    %c0_i32 = arith.constant 0 : i32
    %c0_i32_0 = arith.constant 0 : i32
    return %arg0, %c0_i32 : i32, i32
  }
}

</mosaic_0001>

<bundles_post_ra>
// kernel: tpu_custom_call.1
= control target key start
LH: loop header
LB: loop body
LE: loop exit
PB: predicated region body
PF: predicated region fallthrough
CT: control target
= control target key end

     0   :  { %7 = vsyncpa [#allocation5], 0  ;;  %s162_s0 = inlined_call_operand.hbm [shape: f32[2], index: 0, kind: input, shape index: {}]   ;;  %s163_s1 = inlined_call_operand.hbm [shape: f32[8,128], index: 1, kind: input, shape index: {}]   ;;  %s164_s2 = inlined_call_operand.hbm [shape: f32[8,128], index: 2, kind: output, shape index: {}]  }
   0x1   :  { %8 = vsyncpa [#allocation3], 0 }
   0x2   :  { %9 = vsyncpa [#allocation4], 0  ;;  %s15_s11 = sshll.u32 %s162_s0, 4  ;;  %s24_s14 = sshll.u32 %s163_s1, 4  ;;  %s16_s11 = int_to_ptr.hbm [resolvable:$true] %s15_s11  ;;  %s25_s14 = int_to_ptr.hbm [resolvable:$true] %s24_s14 }
   0x3   :  { %s135_s15 = smov [#allocation2]   ;;  %s136_s16 = smov [#allocation6]  }
   0x4   :  { %18 = dma.hbm_to_smem %s16_s11, 16, %s135_s15, [#allocation5]  }
   0x5   :  { %s26_s17 = sshll.u32 %s136_s16, 4  ;;  %s27_s17 = int_to_ptr.vmem [resolvable:$true] %s26_s17 }
   0x6   :  { %29 = dma.hbm_to_vmem [thread:$0]  %s25_s14, 128, %s27_s17, [#allocation3]  }
   0x7   :  { %129 = dma.done.wait [#allocation5], 16  }
   0x8   :  { %130 = vsyncadd [#allocation5], 4294967280 }
   0x9   :  { %131 = dma.done.wait [#allocation3], 128  }
   0xa   :  { %132 = vsyncadd [#allocation3], 4294967168 }
   0xb   :  { %38 = sfence }
   0xc   :  { %s39_s18 = sld [smem:[#allocation2]]  ;;  %v41_v0 = vld [vmem:[#allocation6] sm:$0xff]  ;;  %s137_s0 = smov [#allocation7]  }
   0xd   :  { %s65_s19 = sld [smem:[#allocation2 + $0x1]]  ;;  %s52_s20 = sshll.u32 %s137_s0, 4  ;;  %s53_s20 = int_to_ptr.vmem [resolvable:$true] %s52_s20 }
   0xe   :  { %s54_s22 = sshll.u32 %s164_s2, 4  ;;  %s55_s22 = int_to_ptr.hbm [resolvable:$true] %s54_s22 }
  0x12   :  { %v42_v1 = vstv %s39_s18 }
  0x13   :  { %v43_v2 = vmul.f32 %v42_v1, %v41_v0  ;;  %v44_v3 = vstv %s65_s19 }
  0x15   :  { %v45_v4 = vadd.f32 %v44_v3, %v43_v2 }
  0x17   :  { %46 = vst [vmem:[#allocation7] sm:$0xff] %v45_v4 }
  0x18   :  { %57 = dma.vmem_to_hbm [thread:$0]  %s53_s20, 128, %s55_s22, [#allocation4]  }
  0x19   :  { %133 = dma.done.wait [#allocation4], 128  }
  0x1a   :  { %134 = vsyncadd [#allocation4], 4294967168 }
  0x1b   :  { %62 = vsyncpa [#allocation3], 1 }
  0x1c   :  { %63 = vsyncpa [#allocation4], 1 }
  0x1d   :  { %64 = vsyncpa [#allocation5], 1 }

</bundles_post_ra>
